<compile_context>
chip_gen: v7x
topology: tpu7x:2x2x1
jax: 0.10.0
libtpu: 0.0.40
codegen_flags: <defaults>
</compile_context>

<pallas_src>
import functools

import jax
import jax.numpy as jnp
from jax import lax
from jax.experimental import pallas as pl
from jax.experimental.pallas import tpu as pltpu


_ATTN_VMEM_BUDGET = 12 * 1024 * 1024     # target working set for attention tiles
_ATTN_VMEM_LIMIT = 32 * 1024 * 1024      # scoped VMEM limit (safe on v5e/v6e/v7x)
_LINEAR_VMEM_LIMIT = 32 * 1024 * 1024


# ----------------------------------------------------------------------------
# helpers: tile / head-group selection (keep blocks (8,128)-legal)
# ----------------------------------------------------------------------------
def _pick_tile(dim, preferred, align):
    """Largest `align`-multiple divisor of `dim` that is <= preferred, else full dim."""
    if dim <= preferred:
        return dim
    t = (preferred // align) * align
    while t >= align:
        if dim % t == 0:
            return t
        t -= align
    # TODO(synk): for large dims with no aligned divisor, pad to the next 128
    # multiple (or add a masked remainder tile) instead of a single huge block.
    return dim


def _pick_heads_per_block(num_heads, dh):
    """Heads per attention grid step; prefer hb*dh % 128 == 0 (lane-dense blocks)."""
    target = max(1, 128 // dh)
    for hb in range(min(num_heads, target), 0, -1):
        if num_heads % hb == 0 and (hb * dh) % 128 == 0:
            return hb
    return num_heads        # hb*dh == D (full last dim) -> always layout-legal


def _attn_vmem_bytes(tq, tkv, hb, dh, itemsize):
    hd = hb * dh
    dbuf = 2 * itemsize * (tq * hd + 2 * tkv * hd + tq * hd) + 2 * 4 * tkv
    scratch = 4 * (2 * hb * tq + hb * tq * dh)
    temps = 2 * 4 * hb * tq * tkv        # score + prob tiles (f32)
    return dbuf + scratch + temps


def _pick_kv_tile(Lk, tq, hb, dh, itemsize, budget=_ATTN_VMEM_BUDGET):
    """Key/value tile: a 128-multiple divisor of Lk that fits the VMEM budget."""
    if Lk <= 128:
        return Lk
    cands = [c for c in (512, 384, 256, 128) if c <= Lk and Lk % c == 0]
    for c in cands:
        if _attn_vmem_bytes(tq, c, hb, dh, itemsize) <= budget:
            return c
    if cands:
        return cands[-1]
    # TODO(synk): masked remainder kv tile for key lengths with no 128-divisor.
    return Lk


# ----------------------------------------------------------------------------
# Pallas kernel 1: linear projection(s)  y_f = x @ W_f + b_f   (F = 1 or 2)
#   x: (tm, tk), W: (F, tk, tn), b: (F, 1, tn), out: (F, tm, tn)
#   F = 2 fuses the K and V projections: one x-tile load feeds both matmuls.
# ----------------------------------------------------------------------------
def _linear_kernel_inplace(x_ref, w_ref, b_ref, o_ref, *, compute_dtype):
    """f32 output: accumulate straight into the (k-invariant) output block."""
    @pl.when(pl.program_id(2) == 0)
    def _():
        o_ref[...] = jnp.broadcast_to(b_ref[...], o_ref.shape).astype(o_ref.dtype)

    x = x_ref[...]
    if compute_dtype is not None:
        x = x.astype(compute_dtype)
    for f in range(w_ref.shape[0]):
        w = w_ref[f]
        if compute_dtype is not None:
            w = w.astype(compute_dtype)
        o_ref[f] += jnp.dot(x, w, preferred_element_type=jnp.float32)


def _linear_kernel_acc(x_ref, w_ref, b_ref, o_ref, acc_ref, *, compute_dtype):
    """Non-f32 output: keep an f32 VMEM accumulator, cast at writeback."""
    @pl.when(pl.program_id(2) == 0)
    def _():
        acc_ref[...] = jnp.zeros_like(acc_ref)

    x = x_ref[...]
    if compute_dtype is not None:
        x = x.astype(compute_dtype)
    for f in range(w_ref.shape[0]):
        w = w_ref[f]
        if compute_dtype is not None:
            w = w.astype(compute_dtype)
        acc_ref[f] += jnp.dot(x, w, preferred_element_type=jnp.float32)

    @pl.when(pl.program_id(2) == pl.num_programs(2) - 1)
    def _():
        o_ref[...] = (acc_ref[...] + b_ref[...]).astype(o_ref.dtype)


def _pallas_linear_impl(x2, w3, b3, *, tm, tn, tk, mxu_dtype):
    F, Din, Dout = w3.shape
    M = x2.shape[0]
    tm = _pick_tile(M, tm, 8)
    tn = _pick_tile(Dout, tn, 128)
    tk = _pick_tile(Din, tk, 128)

    out_dtype = x2.dtype
    inplace = out_dtype == jnp.float32
    kernel = functools.partial(
        _linear_kernel_inplace if inplace else _linear_kernel_acc,
        compute_dtype=mxu_dtype)
    scratch = [] if inplace else [pltpu.VMEM((F, tm, tn), jnp.float32)]

    return pl.pallas_call(
        kernel,
        out_shape=jax.ShapeDtypeStruct((F, M, Dout), out_dtype),
        grid_spec=pltpu.PrefetchScalarGridSpec(
            num_scalar_prefetch=0,
            grid=(M // tm, Dout // tn, Din // tk),      # reduction axis last
            in_specs=[
                pl.BlockSpec((tm, tk), lambda i, j, k: (i, k)),        # x tile
                pl.BlockSpec((F, tk, tn), lambda i, j, k: (0, k, j)),  # W tiles
                pl.BlockSpec((F, 1, tn), lambda i, j, k: (0, 0, j)),   # bias
            ],
            out_specs=pl.BlockSpec((F, tm, tn), lambda i, j, k: (0, i, j)),
            scratch_shapes=scratch,
        ),
        compiler_params=pltpu.CompilerParams(
            dimension_semantics=("parallel", "parallel", "arbitrary"),
            vmem_limit_bytes=_LINEAR_VMEM_LIMIT),
    )(x2, w3, b3)


def pallas_linear(x, w, b, *, tm=512, tn=512, tk=512, mxu_dtype=None):
    """x: (B, L, Din), w: (Din, Dout), b: (Dout,) -> (B, L, Dout)."""
    B, L, Din = x.shape
    Dout = w.shape[1]
    out = _pallas_linear_impl(x.reshape(B * L, Din), w.reshape(1, Din, Dout),
                              b.reshape(1, 1, Dout), tm=tm, tn=tn, tk=tk,
                              mxu_dtype=mxu_dtype)
    return out.reshape(B, L, Dout)          # contiguous reshape: free


def pallas_linear_stacked(x, w_stacked, b_stacked, *, tm=512, tn=512, tk=512,
                          mxu_dtype=None):
    """x: (B, L, Din), w: (F, Din, Dout), b: (F, Dout) -> (F, B, L, Dout)."""
    B, L, Din = x.shape
    F, _, Dout = w_stacked.shape
    out = _pallas_linear_impl(x.reshape(B * L, Din), w_stacked,
                              b_stacked.reshape(F, 1, Dout), tm=tm, tn=tn, tk=tk,
                              mxu_dtype=mxu_dtype)
    return out.reshape(F, B, L, Dout)       # contiguous reshape: free


# ----------------------------------------------------------------------------
# Pallas kernel 2: flash (online-softmax) scaled dot-product attention
#   grid = (batch, head-group, q-tile, kv-tile)  -- kv axis "arbitrary", last.
#   Running max / denom / f32 output accumulator live in VMEM scratch.
# ----------------------------------------------------------------------------
def _attn_kernel(*refs, heads, dh, has_bias, compute_dtype):
    if has_bias:
        q_ref, k_ref, v_ref, bias_ref, o_ref, m_sc, l_sc, acc_sc = refs
    else:
        q_ref, k_ref, v_ref, o_ref, m_sc, l_sc, acc_sc = refs

    kv_step = pl.program_id(3)

    @pl.when(kv_step == 0)
    def _():
        m_sc[...] = jnp.full(m_sc.shape, -jnp.inf, m_sc.dtype)
        l_sc[...] = jnp.zeros_like(l_sc)
        acc_sc[...] = jnp.zeros_like(acc_sc)

    tq = q_ref.shape[0]
    tkv = k_ref.shape[0]

    # TODO(synk): emit head-major (B, H, L, dh) projections so these lane-splitting
    # reshapes (and the finalize transpose) disappear entirely.
    q = q_ref[...].reshape(tq, heads, dh)
    k = k_ref[...].reshape(tkv, heads, dh)
    v = v_ref[...].reshape(tkv, heads, dh)
    if compute_dtype is not None:            # bf16 MXU fast path on v6e/v7x
        q = q.astype(compute_dtype)
        k = k.astype(compute_dtype)
        v = v.astype(compute_dtype)

    # s[h, q, k] = sum_d q[q, h, d] * k[k, h, d]   (scale already folded into Wq)
    s = lax.dot_general(q, k,
                        dimension_numbers=(((2,), (2,)), ((1,), (1,))),
                        preferred_element_type=jnp.float32)       # (hb, tq, tkv)
    if has_bias:
        s = s + bias_ref[...]                                     # (1, tkv) bcast

    m_prev = m_sc[...]
    m_new = jnp.maximum(m_prev, jnp.max(s, axis=-1, keepdims=True))
    alpha = jnp.exp(m_prev - m_new)
    p = jnp.exp(s - m_new)
    l_sc[...] = alpha * l_sc[...] + jnp.sum(p, axis=-1, keepdims=True)

    # pv[h, q, d] = sum_k p[h, q, k] * v[k, h, d]
    pv = lax.dot_general(p.astype(v.dtype), v,
                         dimension_numbers=(((2,), (0,)), ((0,), (1,))),
                         preferred_element_type=jnp.float32)      # (hb, tq, dh)
    acc_sc[...] = alpha * acc_sc[...] + pv
    m_sc[...] = m_new

    @pl.when(kv_step == pl.num_programs(3) - 1)
    def _():
        # Exact reciprocal: it runs once per q-tile (off the kv hot loop), so it is
        # cheap and keeps the 1e-4 tolerance vs. the f32 reference.
        o = acc_sc[...] * pl.reciprocal(l_sc[...])                # (hb, tq, dh)
        o = jnp.transpose(o, (1, 0, 2)).reshape(tq, heads * dh)   # lane-dense store
        o_ref[...] = o.astype(o_ref.dtype)


def pallas_attention(q, k_arr, v_arr, bias, num_heads, *, kv_stacked=False,
                     tq=128, mxu_dtype=None):
    """q: (B, Lq, D).  If kv_stacked, k_arr is v_arr is a (2, B, Lk, D) array with
    K at index 0 and V at index 1; otherwise k_arr/v_arr are (B, Lk, D).
    bias: optional (B, 1, Lk) additive f32 padding mask (0 valid, -1e9 padded)."""
    B, Lq, D = q.shape
    Lk = k_arr.shape[-2]
    dh = D // num_heads
    hb = _pick_heads_per_block(num_heads, dh)   # heads per grid step
    hd = hb * dh                                # head-group width (lanes)
    n_groups = num_heads // hb
    tq = _pick_tile(Lq, tq, 8)
    tkv = _pick_kv_tile(Lk, tq, hb, dh, q.dtype.itemsize)
    n_kv = Lk // tkv

    has_bias = bias is not None
    kernel = functools.partial(_attn_kernel, heads=hb, dh=dh,
                               has_bias=has_bias, compute_dtype=mxu_dtype)

    if kv_stacked:
        k_spec = pl.BlockSpec((None, None, tkv, hd), lambda b, g, t, s: (0, b, s, g))
        v_spec = pl.BlockSpec((None, None, tkv, hd), lambda b, g, t, s: (1, b, s, g))
    else:
        k_spec = pl.BlockSpec((None, tkv, hd), lambda b, g, t, s: (b, s, g))
        v_spec = pl.BlockSpec((None, tkv, hd), lambda b, g, t, s: (b, s, g))

    in_specs = [pl.BlockSpec((None, tq, hd), lambda b, g, t, s: (b, t, g)), k_spec, v_spec]
    args = [q, k_arr, v_arr]
    if has_bias:
        in_specs.append(pl.BlockSpec((None, 1, tkv), lambda b, g, t, s: (b, 0, s)))
        args.append(bias)

    return pl.pallas_call(
        kernel,
        out_shape=jax.ShapeDtypeStruct((B, Lq, D), q.dtype),
        grid_spec=pltpu.PrefetchScalarGridSpec(
            num_scalar_prefetch=0,
            grid=(B, n_groups, Lq // tq, n_kv),          # kv reduction axis last
            in_specs=in_specs,
            out_specs=pl.BlockSpec((None, tq, hd), lambda b, g, t, s: (b, t, g)),
            scratch_shapes=[
                pltpu.VMEM((hb, tq, 1), jnp.float32),    # running max
                pltpu.VMEM((hb, tq, 1), jnp.float32),    # running denominator
                pltpu.VMEM((hb, tq, dh), jnp.float32),   # output accumulator
            ],
        ),
        compiler_params=pltpu.CompilerParams(
            # b/g/t parallel (megacore sharding on v7x; B >= 2), kv arbitrary.
            dimension_semantics=("parallel", "parallel", "parallel", "arbitrary"),
            vmem_limit_bytes=_ATTN_VMEM_LIMIT),
    )(*args)


# ----------------------------------------------------------------------------
# CrossAttention forward (wraps MultiHeadAttention with mask_attn=None)
# ----------------------------------------------------------------------------
def init_cross_attention_params(key, model_dimension):
    keys = jax.random.split(key, 8)

    def lin(kw, kb):
        w = 0.02 * jax.random.normal(kw, (model_dimension, model_dimension), jnp.float32)
        b = 0.02 * jax.random.normal(kb, (model_dimension,), jnp.float32)
        return w, b

    wq, bq = lin(keys[0], keys[1])
    wk, bk = lin(keys[2], keys[3])
    wv, bv = lin(keys[4], keys[5])
    wo, bo = lin(keys[6], keys[7])
    return dict(wq=wq, bq=bq, wk=wk, bk=bk, wv=wv, bv=bv, wo=wo, bo=bo)


def cross_attention(params, _K, _V, _Q, num_heads, mask_pad=None, *, mxu_dtype=None):
    """CrossAttention.forward(_K, _V, _Q, mask_pad): MHA with no causal mask.

    mxu_dtype=jnp.bfloat16 enables the full-rate MXU path on v6e/v7x (f32 acc);
    default None keeps exact f32 semantics."""
    B, Lk, D = _K.shape
    assert D % num_heads == 0
    dh = D // num_heads
    scale = 1.0 / float(dh) ** 0.5

    # Fold the 1/sqrt(dh) softmax scale into the Q projection (weight-sized op,
    # done once per call here; fold at parameter setup in a real model).
    wq = params["wq"] * scale
    bq = params["bq"] * scale
    q = pallas_linear(_Q, wq, bq, mxu_dtype=mxu_dtype)

    if _K is _V:
        # Fused K/V projection: encoder activations streamed from HBM once; the
        # stacked (2, B, Lk, D) output is consumed by the attention kernel with
        # K at leading index 0 and V at index 1 (no splits, no extra copies).
        wkv = jnp.stack([params["wk"], params["wv"]])          # (2, D, D)
        bkv = jnp.stack([params["bk"], params["bv"]])          # (2, D)
        kv = pallas_linear_stacked(_K, wkv, bkv, mxu_dtype=mxu_dtype)
        k_arr = v_arr = kv
        kv_stacked = True
    else:
        k_arr = pallas_linear(_K, params["wk"], params["bk"], mxu_dtype=mxu_dtype)
        v_arr = pallas_linear(_V, params["wv"], params["bv"], mxu_dtype=mxu_dtype)
        kv_stacked = False

    # Additive padding bias (0 = valid key position, -1e9 = padded); skipped when
    # there is no mask so the kernel omits the bias input and the VPU add.
    bias = None
    if mask_pad is not None:
        bias = jnp.where(mask_pad, 0.0, -1e9).astype(jnp.float32).reshape(B, 1, Lk)

    o = pallas_attention(q, k_arr, v_arr, bias, num_heads,
                         kv_stacked=kv_stacked, mxu_dtype=mxu_dtype)
    return pallas_linear(o, params["wo"], params["bo"], mxu_dtype=mxu_dtype)


# ----------------------------------------------------------------------------
# Pure-JAX reference (for correctness check only)
# ----------------------------------------------------------------------------
def reference_cross_attention(params, _K, _V, _Q, num_heads, mask_pad=None):
    B, Lk, D = _K.shape
    Lq = _Q.shape[1]
    H, dh = num_heads, D // num_heads
    q = _Q @ params["wq"] + params["bq"]
    k = _K @ params["wk"] + params["bk"]
    v = _V @ params["wv"] + params["bv"]
    qh = q.reshape(B, Lq, H, dh).transpose(0, 2, 1, 3)
    kh = k.reshape(B, Lk, H, dh).transpose(0, 2, 1, 3)
    vh = v.reshape(B, Lk, H, dh).transpose(0, 2, 1, 3)
    s = jnp.einsum("bhqd,bhkd->bhqk", qh, kh) / jnp.sqrt(float(dh))
    if mask_pad is not None:
        s = jnp.where(mask_pad[:, None, None, :], s, -1e9)
    p = jax.nn.softmax(s, axis=-1)
    oh = jnp.einsum("bhqk,bhkd->bhqd", p, vh)
    o = oh.transpose(0, 2, 1, 3).reshape(B, Lq, D)
    return o @ params["wo"] + params["bo"]


if __name__ == "__main__":
    key = jax.random.PRNGKey(0)
    kp, kq, ke, kv2 = jax.random.split(key, 4)

    B, Lq, Lk, D, H = 2, 8, 16, 32, 4   # small shapes; D divisible by H

    params = init_cross_attention_params(kp, D)
    Q = jax.random.normal(kq, (B, Lq, D), jnp.float32)     # decoder states
    enc = jax.random.normal(ke, (B, Lk, D), jnp.float32)   # encoder states (K = V)

    lengths = jnp.array([Lk, Lk - 5], jnp.int32)
    mask_pad = jnp.arange(Lk)[None, :] < lengths[:, None]  # True = valid key pos

    # Fused-KV path (_K is _V) with a padding mask.
    out = cross_attention(params, enc, enc, Q, H, mask_pad=mask_pad)
    out = jax.block_until_ready(out)
    ref = reference_cross_attention(params, enc, enc, Q, H, mask_pad=mask_pad)
    assert out.shape == (B, Lq, D)
    assert bool(jnp.allclose(out, ref, atol=1e-4, rtol=1e-4))

    # Unfused path (distinct _K / _V) with no mask (bias input skipped).
    V2 = jax.random.normal(kv2, (B, Lk, D), jnp.float32)
    out2 = cross_attention(params, enc, V2, Q, H, mask_pad=None)
    out2 = jax.block_until_ready(out2)
    ref2 = reference_cross_attention(params, enc, V2, Q, H, mask_pad=None)
    assert bool(jnp.allclose(out2, ref2, atol=1e-4, rtol=1e-4))

    print("KERNEL_OK")
</pallas_src>

<mosaic_0001>
module attributes {stable_mosaic.version = 11 : i64} {
  func.func @_linear_kernel_inplace(%arg0: i32, %arg1: i32, %arg2: i32, %arg3: memref<16x32xf32, #tpu.memory_space<vmem>>, %arg4: memref<1x32x32xf32, #tpu.memory_space<vmem>>, %arg5: memref<1x1x32xf32, #tpu.memory_space<vmem>>, %arg6: memref<1x16x32xf32, #tpu.memory_space<vmem>>) attributes {dimension_semantics = [#tpu.dimension_semantics<parallel>, #tpu.dimension_semantics<parallel>, #tpu.dimension_semantics<arbitrary>], iteration_bounds = array<i64: 1, 1, 1>, scalar_prefetch = 0 : i64, scratch_operands = 0 : i64, tpu.core_type = #tpu.core_type<tc>, window_params = [{transform_indices = @transform_0, window_bounds = array<i64: 16, 32>}, {transform_indices = @transform_1, window_bounds = array<i64: 1, 32, 32>}, {transform_indices = @transform_2, window_bounds = array<i64: 1, 1, 32>}, {transform_indices = @transform_3, window_bounds = array<i64: 1, 16, 32>}]} {
    %c0_i32 = arith.constant 0 : i32
    %0 = arith.cmpi eq, %arg2, %c0_i32 : i32
    %1 = arith.extui %0 : i1 to i32
    %c0_i32_0 = arith.constant 0 : i32
    %2 = arith.cmpi ne, %1, %c0_i32_0 : i32
    scf.if %2 {
      %c0_11 = arith.constant 0 : index
      %c0_12 = arith.constant 0 : index
      %c0_13 = arith.constant 0 : index
      %13 = vector.load %arg5[%c0_11, %c0_12, %c0_13] : memref<1x1x32xf32, #tpu.memory_space<vmem>>, vector<1x1x32xf32>
      %14 = vector.shape_cast %13 : vector<1x1x32xf32> to vector<1x1x32xf32>
      %15 = vector.broadcast %14 : vector<1x1x32xf32> to vector<1x16x32xf32>
      %c0_14 = arith.constant 0 : index
      %c0_15 = arith.constant 0 : index
      %c0_16 = arith.constant 0 : index
      %16 = vector.load %arg6[%c0_14, %c0_15, %c0_16] : memref<1x16x32xf32, #tpu.memory_space<vmem>>, vector<1x16x32xf32>
      tpu.vector_store %arg6[%c0_14, %c0_15, %c0_16], %15 {strides = array<i32>} : memref<1x16x32xf32, #tpu.memory_space<vmem>>, vector<1x16x32xf32>,
    } else {
    }
    %c0 = arith.constant 0 : index
    %c0_1 = arith.constant 0 : index
    %3 = vector.load %arg3[%c0, %c0_1] : memref<16x32xf32, #tpu.memory_space<vmem>>, vector<16x32xf32>
    %c0_2 = arith.constant 0 : index
    %c0_3 = arith.constant 0 : index
    %c0_4 = arith.constant 0 : index
    %4 = vector.load %arg4[%c0_2, %c0_3, %c0_4] : memref<1x32x32xf32, #tpu.memory_space<vmem>>, vector<1x32x32xf32>
    %5 = vector.shape_cast %4 : vector<1x32x32xf32> to vector<32x32xf32>
    %c0_5 = arith.constant 0 : index
    %c0_6 = arith.constant 0 : index
    %c0_7 = arith.constant 0 : index
    %6 = vector.load %arg6[%c0_5, %c0_6, %c0_7] : memref<1x16x32xf32, #tpu.memory_space<vmem>>, vector<1x16x32xf32>
    %7 = vector.shape_cast %6 : vector<1x16x32xf32> to vector<16x32xf32>
    %cst = arith.constant dense<0.000000e+00> : vector<16x32xf32>
    %8 = tpu.matmul %3, %5, %cst {dimension_numbers = #tpu.dot_dimension_numbers<[1], [0], [0], [1], [0, 0, 1, 1], [], []>} : vector<16x32xf32>, vector<32x32xf32>, vector<16x32xf32> -> vector<16x32xf32>
    %9 = arith.addf %7, %8 : vector<16x32xf32>
    %c0_8 = arith.constant 0 : index
    %c0_9 = arith.constant 0 : index
    %c0_10 = arith.constant 0 : index
    %10 = vector.load %arg6[%c0_8, %c0_9, %c0_10] : memref<1x16x32xf32, #tpu.memory_space<vmem>>, vector<1x16x32xf32>
    %11 = vector.shape_cast %10 : vector<1x16x32xf32> to vector<16x32xf32>
    %12 = vector.shape_cast %9 : vector<16x32xf32> to vector<1x16x32xf32>
    tpu.vector_store %arg6[%c0_8, %c0_9, %c0_10], %12 {strides = array<i32>} : memref<1x16x32xf32, #tpu.memory_space<vmem>>, vector<1x16x32xf32>,
    return
  }
  func.func @transform_0(%arg0: i32, %arg1: i32, %arg2: i32) -> (i32, i32) {
    %c0_i32 = arith.constant 0 : i32
    return %arg0, %arg2 : i32, i32
  }
  func.func @transform_1(%arg0: i32, %arg1: i32, %arg2: i32) -> (i32, i32, i32) {
    %c0_i32 = arith.constant 0 : i32
    %c0_i32_0 = arith.constant 0 : i32
    return %c0_i32, %arg2, %arg1 : i32, i32, i32
  }
  func.func @transform_2(%arg0: i32, %arg1: i32, %arg2: i32) -> (i32, i32, i32) {
    %c0_i32 = arith.constant 0 : i32
    %c0_i32_0 = arith.constant 0 : i32
    %c0_i32_1 = arith.constant 0 : i32
    return %c0_i32, %c0_i32_0, %arg1 : i32, i32, i32
  }
  func.func @transform_3(%arg0: i32, %arg1: i32, %arg2: i32) -> (i32, i32, i32) {
    %c0_i32 = arith.constant 0 : i32
    %c0_i32_0 = arith.constant 0 : i32
    return %c0_i32, %arg0, %arg1 : i32, i32, i32
  }
}

</mosaic_0001>

<bundles_post_ra>
// kernel: tpu_custom_call.1
= control target key start
LH: loop header
LB: loop body
LE: loop exit
PB: predicated region body
PF: predicated region fallthrough
CT: control target
= control target key end

     0   :  { %8 = vsyncpa [#allocation3], 0  ;;  %s353_s0 = inlined_call_operand.hbm [shape: f32[16,32], index: 0, kind: input, shape index: {}]   ;;  %s354_s1 = inlined_call_operand.hbm [shape: f32[1,32,32], index: 1, kind: input, shape index: {}]   ;;  %s355_s2 = inlined_call_operand.vmem [shape: f32[1,1,32], index: 2, kind: input, shape index: {}]   ;;  %s356_s3 = inlined_call_operand.hbm [shape: f32[1,16,32], index: 3, kind: output, shape index: {}]  }
   0x1   :  { %9 = vsyncpa [#allocation6], 0 }
   0x2   :  { %10 = vsyncpa [#allocation4], 0  ;;  %s274_s12 = smov [#allocation2]   ;;  %s202_s16 = scalar_lea.hbm %s353_s0, 256 }
   0x3   :  { %s16_s13 = sshll.u32 %s274_s12, 4  ;;  %p203_p0 = scmp.ne.s32.totalorder %s353_s0, %s202_s16  ;;  %s17_s13 = int_to_ptr.vmem [resolvable:$true] %s16_s13 }
   0x4   :  { %p206_p1 = scmp.lt.u32.totalorder %s202_s16, %s353_s0 }
   0x6   :  { %p208_p2 = pnand %p206_p1, %p203_p0 }
   0x8   :  { %211 = shalt.err (!%p208_p2)
}
   0x9   :  { %s212_s21 = scalar_lea.vmem %s17_s13, 256  ;;  %p217_p4 = scmp.lt.s32.totalorder %s17_s13, %s17_s13 }
   0xa   :  { %p213_p3 = scmp.ne.s32.totalorder %s17_s13, %s212_s21  ;;  %p218_p5 = scmp.lt.s32.totalorder %s212_s21, %s212_s21 }
   0xc   :  { %p219_p6 = por %p218_p5, %p217_p4 }
   0xe   :  { %p220_p7 = pnand %p219_p6, %p213_p3 }
  0x10   :  { %223 = shalt.err (!%p220_p7)
}
  0x11   :  { %s275_s22 = smov 128   ;;  %s276_s23 = smov 8  }
  0x12   :  { %22 = dma.hbm_to_vmem [thread:$0]  %s353_s0, 256, %s17_s13, [#allocation3], %s275_s22, %s275_s22, %s276_s23  }
  0x13   :  { %s277_s26 = smov [#allocation5]   ;;  %s224_s30 = scalar_lea.hbm %s354_s1, 512 }
  0x14   :  { %s28_s27 = sshll.u32 %s277_s26, 4  ;;  %p225_p8 = scmp.ne.s32.totalorder %s354_s1, %s224_s30  ;;  %s29_s27 = int_to_ptr.vmem [resolvable:$true] %s28_s27 }
  0x15   :  { %p228_p9 = scmp.lt.u32.totalorder %s224_s30, %s354_s1 }
  0x17   :  { %p230_p10 = pnand %p228_p9, %p225_p8 }
  0x19   :  { %233 = shalt.err (!%p230_p10)
}
  0x1a   :  { %s234_s8 = scalar_lea.vmem %s29_s27, 512  ;;  %p239_p12 = scmp.lt.s32.totalorder %s29_s27, %s29_s27 }
  0x1b   :  { %p235_p11 = scmp.ne.s32.totalorder %s29_s27, %s234_s8  ;;  %p240_p13 = scmp.lt.s32.totalorder %s234_s8, %s234_s8 }
  0x1d   :  { %p241_p0 = por %p240_p13, %p239_p12 }
  0x1f   :  { %p242_p1 = pnand %p241_p0, %p235_p11 }
  0x21   :  { %245 = shalt.err (!%p242_p1)
}
  0x22   :  { %34 = dma.hbm_to_vmem [thread:$0]  %s354_s1, 512, %s29_s27, [#allocation6], %s275_s22, %s275_s22, %s276_s23  }
  0x23   :  { %268 = dma.done.wait [#allocation3], 256  }
  0x24   :  { %269 = vsyncadd [#allocation3], 4294967040 }
  0x25   :  { %270 = dma.done.wait [#allocation6], 512  }
  0x26   :  { %271 = vsyncadd [#allocation6], 4294966784  ;;  %vm54_vm0 = vcmask 261120   ;;  %v59_v0 = vld [vmem:[#allocation5] sm:$0xff]  ;;  %v60_v1 = vld [vmem:[#allocation5 + $0x8] sm:$0xff]  ;;  %s278_s1 = smov [#allocation7]  }
  0x27   :  { %v61_v2 = vld [vmem:[#allocation5 + $0x10] sm:$0xff]  ;;  %v189_v3 = vpack.c.bf16 %v60_v1, %v59_v0  ;;  %v62_v4 = vld [vmem:[#allocation5 + $0x18] sm:$0xff]  ;;  %s156_s12 = sshll.u32 %s278_s1, 4  ;;  %s157_s12 = int_to_ptr.vmem [resolvable:$true] %s156_s12 }
  0x28   :  { %v169_v5 = vld [vmem:[%s355_s2] ss:$0 sm:$0xff]  ;;  %v193_v7 = vpack.c.bf16 %v62_v4, %v61_v2  ;;  %v58_v8 = vld [vmem:[#allocation2 + $0x8] sm:$0xff]  ;;  %s246_s2 = scalar_lea.vmem %s157_s12, 256  ;;  %p251_p3 = scmp.lt.s32.totalorder %s157_s12, %s157_s12 }
  0x29   :  { %v57_v6 = vld [vmem:[#allocation2] sm:$0xff]  ;;  %55 = vst.msk [vmem:[#allocation7] sm:$0xff] %vm54_vm0, %v169_v5  ;;  %56 = vst.msk [vmem:[#allocation7 + $0x8] sm:$0xff] %vm54_vm0, %v169_v5  ;;  %190 = vmatprep.subr.bf16.mxu0 %v189_v3  ;;  %p247_p2 = scmp.ne.s32.totalorder %s157_s12, %s246_s2  ;;  %p252_p4 = scmp.lt.s32.totalorder %s246_s2, %s246_s2 }
  0x2a   :  { %186 = vmatprep.mubr.msk.f32.mxu0 %vm54_vm0, %v57_v6  ;;  %192 = vmatpush3.bf16.msra.mxu0 %v189_v3 }
  0x2b   :  { %194 = vmatprep.subr.bf16.mxu0 %v193_v7  ;;  %p253_p5 = por %p252_p4, %p251_p3 }
  0x2d   :  { %p254_p6 = pnand %p253_p5, %p247_p2 }
  0x2e   :  { %196 = vmatpush3.bf16.msra.mxu0 %v193_v7 }
  0x30   :  { %v64_v9 = vld [vmem:[#allocation7 + $0x8] sm:$0xff]  ;;  %v63_v10 = vld [vmem:[#allocation7] sm:$0xff] }
  0x31   :  { %187 = vmatmul.mubr.msk.f32.vlgmr.msra.gmra.mrb[0].mxu0 %vm54_vm0, %v58_v8 }
 0x104   :  { %v188_v11 = vpop.f32.mrb[0].mxu0 }
 0x105   :  { %v148_v12 = vadd.f32 %v188_v11, %v64_v9  ;;  %v138_v13 = vpop.f32.mrb[1].mxu0 }
 0x106   :  { %v147_v14 = vadd.f32 %v138_v13, %v63_v10 }
 0x107   :  { %150 = vst.msk [vmem:[#allocation7 + $0x8] sm:$0xff] %vm54_vm0, %v148_v12 }
 0x108   :  { %149 = vst.msk [vmem:[#allocation7] sm:$0xff] %vm54_vm0, %v147_v14 }
 0x109   :  { %257 = shalt.err (!%p254_p6)
}
 0x10a   :  { %s258_s15 = scalar_lea.hbm %s356_s3, 256 }
 0x10b   :  { %p259_p7 = scmp.ne.s32.totalorder %s356_s3, %s258_s15  ;;  %p262_p8 = scmp.lt.u32.totalorder %s258_s15, %s356_s3 }
 0x10d   :  { %p264_p9 = pnand %p262_p8, %p259_p7 }
 0x10f   :  { %267 = shalt.err (!%p264_p9)
}
 0x110   :  { %162 = dma.vmem_to_hbm [thread:$0]  %s157_s12, 256, %s356_s3, [#allocation4], %s275_s22, %s275_s22, %s276_s23  }
 0x111   :  { %272 = dma.done.wait [#allocation4], 256  }
 0x112   :  { %273 = vsyncadd [#allocation4], 4294967040 }
 0x113   :  { %166 = vsyncpa [#allocation3], 1 }
 0x114   :  { %167 = vsyncpa [#allocation6], 1 }
 0x115   :  { %168 = vsyncpa [#allocation4], 1 }

</bundles_post_ra>
